<compile_context>
chip_gen: v6e
topology: v6e:2x2x1
jax: 0.10.0
libtpu: 0.0.40
codegen_flags: <defaults>
</compile_context>

<pallas_src>
import jax
import jax.numpy as jnp
from jax.experimental import pallas as pl
from jax.experimental.pallas import tpu as pltpu


def _round_up(x, m):
    return (x + m - 1) // m * m


def _disc_fwd_kernel(x_ref, w1_ref, b1_ref, w2_ref, b2_ref, out_ref):
    # Hidden layer: (tb, F) @ (F, Hp) -> f32 accumulate on the MXU.
    h = jnp.dot(x_ref[...], w1_ref[...], preferred_element_type=jnp.float32)
    h = h + b1_ref[...].astype(jnp.float32)
    # LeakyReLU, negative_slope = 0.01 (PyTorch default).
    h = jnp.where(h >= 0.0, h, 0.01 * h)
    # TODO(synk): torch.nn.Dropout is identity in eval mode; training-mode dropout would
    # use pltpu.prng_seed / pltpu.stateful_bernoulli here.

    # Output layer: (tb, Hp) @ (Hp, Cp) -> f32 accumulate. Cast h back to the weight
    # dtype so bf16 weights keep the native bf16-in / f32-acc MXU mode (no-op for f32).
    logits = jnp.dot(
        h.astype(w2_ref.dtype), w2_ref[...], preferred_element_type=jnp.float32
    ) + b2_ref[...].astype(jnp.float32)                      # (tb, Cp)

    # Softmax over classes. Padded classes carry a -1e30 bias -> exp underflows to 0,
    # so they do not perturb the denominator.
    m = jnp.max(logits, axis=-1, keepdims=True)
    e = jnp.exp(logits - m)
    s = jnp.sum(e, axis=-1, keepdims=True)
    inv = pl.reciprocal(s, approx=True)          # EUP seed (free slot)
    inv = inv * (2.0 - s * inv)                  # one Newton step -> full f32 accuracy
    out_ref[...] = (e * inv).astype(out_ref.dtype)


def discriminator_forward(features, w1, b1, w2, b2, *, tb=256):
    """Fused Discriminator forward.

    features : (B, F)   input features (native dtype)
    w1       : (F, H)   hidden_layer weight, (in, out) layout
    b1       : (1, H)   hidden_layer bias
    w2       : (H, C)   output_layer weight, (in, out) layout; C = nclasses + 1
    b2       : (1, C)   output_layer bias
    returns  : (B, C)   softmax probabilities
    """
    B, F = features.shape
    H = w1.shape[1]
    C = w2.shape[1]
    assert w1.shape == (F, H) and b1.shape == (1, H)
    assert w2.shape == (H, C) and b2.shape == (1, C)

    # ---- lane-dense padding of the tiny hidden / class dims (wrapper-side, cheap) ----
    Hp = _round_up(H, 128)
    Cp = _round_up(C, 128)
    if Hp != H:
        w1 = jnp.pad(w1, ((0, 0), (0, Hp - H)))
        b1 = jnp.pad(b1, ((0, 0), (0, Hp - H)))
        w2 = jnp.pad(w2, ((0, Hp - H), (0, 0)))            # zero rows -> no logit effect
    if Cp != C:
        w2 = jnp.pad(w2, ((0, 0), (0, Cp - C)))
        # Padded classes get a huge negative bias so softmax assigns them exactly 0.
        b2 = jnp.pad(b2, ((0, 0), (0, Cp - C)), constant_values=-1e30)

    # ---- batch tiling: big tiles, but keep >= 2 parallel tiles for v7x's 2 TCs ----
    Bp8 = _round_up(B, 8)
    tb = max(8, min((tb // 8) * 8, Bp8))
    if Bp8 // tb < 2 and Bp8 >= 16:
        tb = max(8, ((Bp8 // 2) // 8) * 8)
    Bp = _round_up(B, tb)
    x = features if Bp == B else jnp.pad(features, ((0, Bp - B), (0, 0)))

    grid = (Bp // tb,)
    isz = x.dtype.itemsize
    cost = pl.CostEstimate(
        flops=2 * Bp * F * Hp + 2 * Bp * Hp * Cp,
        transcendentals=Bp * Cp + Bp,
        bytes_accessed=(Bp * F + F * Hp + Hp + Hp * Cp + Cp + Bp * Cp) * isz,
    )

    out = pl.pallas_call(
        _disc_fwd_kernel,
        out_shape=jax.ShapeDtypeStruct((Bp, Cp), features.dtype),
        grid_spec=pl.GridSpec(
            grid=grid,
            in_specs=[
                pl.BlockSpec((tb, F), lambda i: (i, 0)),   # streamed batch row tile
                pl.BlockSpec((F, Hp), lambda i: (0, 0)),   # W1 resident
                pl.BlockSpec((1, Hp), lambda i: (0, 0)),   # b1 resident
                pl.BlockSpec((Hp, Cp), lambda i: (0, 0)),  # W2 resident
                pl.BlockSpec((1, Cp), lambda i: (0, 0)),   # b2 resident
            ],
            out_specs=pl.BlockSpec((tb, Cp), lambda i: (i, 0)),
        ),
        compiler_params=pltpu.CompilerParams(
            dimension_semantics=("parallel",),
            vmem_limit_bytes=32 * 1024 * 1024,   # safe on v5e/v6e/v7x, far above need
        ),
        cost_estimate=cost,
    )(x, w1, b1, w2, b2)

    return out[:B, :C]


def _reference(features, w1, b1, w2, b2):
    """Pure-JAX reference mirroring the PyTorch forward (eval mode)."""
    h = features.astype(jnp.float32) @ w1.astype(jnp.float32) + b1.astype(jnp.float32)
    h = jnp.where(h >= 0.0, h, 0.01 * h)
    logits = h @ w2.astype(jnp.float32) + b2.astype(jnp.float32)
    return jax.nn.softmax(logits, axis=-1).astype(features.dtype)


if __name__ == "__main__":
    key = jax.random.PRNGKey(0)
    k1, k2, k3, k4, k5 = jax.random.split(key, 5)

    # Shapes consistent with the module:
    #   bert_features = 256, discriminator_hidden_layer = 64, nclasses = 4 -> C = 5
    B, F, H, nclasses = 256, 256, 64, 4
    C = nclasses + 1

    features = jax.random.normal(k1, (B, F), dtype=jnp.float32)
    w1 = jax.random.normal(k2, (F, H), dtype=jnp.float32) * 0.05
    b1 = jax.random.normal(k3, (1, H), dtype=jnp.float32) * 0.05
    w2 = jax.random.normal(k4, (H, C), dtype=jnp.float32) * 0.05
    b2 = jax.random.normal(k5, (1, C), dtype=jnp.float32) * 0.05

    out = discriminator_forward(features, w1, b1, w2, b2)
    out = jax.block_until_ready(out)

    ref = _reference(features, w1, b1, w2, b2)
    assert out.shape == (B, C)
    assert jnp.allclose(out, ref, rtol=1e-5, atol=1e-5), (out, ref)
    # Rows are valid probability distributions.
    assert jnp.allclose(jnp.sum(out, axis=-1), 1.0, rtol=1e-5, atol=1e-5)

    print("KERNEL_OK")
</pallas_src>

<mosaic_0001>
module attributes {stable_mosaic.version = 11 : i64} {
  func.func @_disc_fwd_kernel(%arg0: i32, %arg1: memref<128x256xf32, #tpu.memory_space<vmem>>, %arg2: memref<256x128xf32, #tpu.memory_space<vmem>>, %arg3: memref<1x128xf32, #tpu.memory_space<vmem>>, %arg4: memref<128x128xf32, #tpu.memory_space<vmem>>, %arg5: memref<1x128xf32, #tpu.memory_space<vmem>>, %arg6: memref<128x128xf32, #tpu.memory_space<vmem>>) attributes {dimension_semantics = [#tpu.dimension_semantics<parallel>], iteration_bounds = array<i64: 2>, scalar_prefetch = 0 : i64, scratch_operands = 0 : i64, tpu.core_type = #tpu.core_type<tc>, window_params = [{transform_indices = @transform_0, window_bounds = array<i64: 128, 256>}, {pipeline_mode = #tpu.pipeline_mode<synchronous>, transform_indices = @transform_1, window_bounds = array<i64: 256, 128>}, {pipeline_mode = #tpu.pipeline_mode<synchronous>, transform_indices = @transform_2, window_bounds = array<i64: 1, 128>}, {pipeline_mode = #tpu.pipeline_mode<synchronous>, transform_indices = @transform_3, window_bounds = array<i64: 128, 128>}, {pipeline_mode = #tpu.pipeline_mode<synchronous>, transform_indices = @transform_4, window_bounds = array<i64: 1, 128>}, {transform_indices = @transform_5, window_bounds = array<i64: 128, 128>}]} {
    %c0 = arith.constant 0 : index
    %c0_0 = arith.constant 0 : index
    %0 = vector.load %arg1[%c0, %c0_0] : memref<128x256xf32, #tpu.memory_space<vmem>>, vector<128x256xf32>
    %c0_1 = arith.constant 0 : index
    %c0_2 = arith.constant 0 : index
    %1 = vector.load %arg2[%c0_1, %c0_2] : memref<256x128xf32, #tpu.memory_space<vmem>>, vector<256x128xf32>
    %cst = arith.constant dense<0.000000e+00> : vector<128x128xf32>
    %2 = tpu.matmul %0, %1, %cst {dimension_numbers = #tpu.dot_dimension_numbers<[1], [0], [0], [1], [0, 0, 1, 1], [], []>} : vector<128x256xf32>, vector<256x128xf32>, vector<128x128xf32> -> vector<128x128xf32>
    %c0_3 = arith.constant 0 : index
    %c0_4 = arith.constant 0 : index
    %3 = vector.load %arg3[%c0_3, %c0_4] : memref<1x128xf32, #tpu.memory_space<vmem>>, vector<1x128xf32>
    %4 = vector.broadcast %3 : vector<1x128xf32> to vector<128x128xf32>
    %5 = arith.addf %2, %4 : vector<128x128xf32>
    %cst_5 = arith.constant 0.000000e+00 : f32
    %6 = vector.broadcast %cst_5 : f32 to vector<128x128xf32>
    %7 = arith.cmpf oge, %5, %6 : vector<128x128xf32>
    %cst_6 = arith.constant 0.00999999977 : f32
    %8 = vector.broadcast %cst_6 : f32 to vector<128x128xf32>
    %9 = arith.mulf %8, %5 : vector<128x128xf32>
    %10 = arith.select %7, %5, %9 : vector<128x128xi1>, vector<128x128xf32>
    %c0_7 = arith.constant 0 : index
    %c0_8 = arith.constant 0 : index
    %11 = vector.load %arg4[%c0_7, %c0_8] : memref<128x128xf32, #tpu.memory_space<vmem>>, vector<128x128xf32>
    %cst_9 = arith.constant dense<0.000000e+00> : vector<128x128xf32>
    %12 = tpu.matmul %10, %11, %cst_9 {dimension_numbers = #tpu.dot_dimension_numbers<[1], [0], [0], [1], [0, 0, 1, 1], [], []>} : vector<128x128xf32>, vector<128x128xf32>, vector<128x128xf32> -> vector<128x128xf32>
    %c0_10 = arith.constant 0 : index
    %c0_11 = arith.constant 0 : index
    %13 = vector.load %arg5[%c0_10, %c0_11] : memref<1x128xf32, #tpu.memory_space<vmem>>, vector<1x128xf32>
    %14 = vector.broadcast %13 : vector<1x128xf32> to vector<128x128xf32>
    %15 = arith.addf %12, %14 : vector<128x128xf32>
    %cst_12 = arith.constant dense<0xFF800000> : vector<128xf32>
    %16 = vector.multi_reduction <maximumf>, %15, %cst_12 [1] : vector<128x128xf32> to vector<128xf32>
    %17 = vector.shape_cast %16 : vector<128xf32> to vector<128x1xf32>
    %18 = vector.broadcast %17 : vector<128x1xf32> to vector<128x128xf32>
    %19 = arith.subf %15, %18 : vector<128x128xf32>
    %20 = math.exp %19 : vector<128x128xf32>
    %cst_13 = arith.constant dense<0.000000e+00> : vector<128xf32>
    %21 = vector.multi_reduction <add>, %20, %cst_13 [1] : vector<128x128xf32> to vector<128xf32>
    %22 = vector.shape_cast %21 : vector<128xf32> to vector<128x1xf32>
    %23 = tpu.reciprocal %22 {approx = true} : vector<128x1xf32> -> vector<128x1xf32>
    %24 = arith.mulf %22, %23 : vector<128x1xf32>
    %cst_14 = arith.constant 2.000000e+00 : f32
    %25 = vector.broadcast %cst_14 : f32 to vector<128x1xf32>
    %26 = arith.subf %25, %24 : vector<128x1xf32>
    %27 = arith.mulf %23, %26 : vector<128x1xf32>
    %28 = vector.broadcast %27 : vector<128x1xf32> to vector<128x128xf32>
    %29 = arith.mulf %20, %28 : vector<128x128xf32>
    %c0_15 = arith.constant 0 : index
    %c0_16 = arith.constant 0 : index
    %30 = vector.load %arg6[%c0_15, %c0_16] : memref<128x128xf32, #tpu.memory_space<vmem>>, vector<128x128xf32>
    tpu.vector_store %arg6[%c0_15, %c0_16], %29 {strides = array<i32>} : memref<128x128xf32, #tpu.memory_space<vmem>>, vector<128x128xf32>,
    return
  }
  func.func @transform_0(%arg0: i32) -> (i32, i32) {
    %c0_i32 = arith.constant 0 : i32
    %c0_i32_0 = arith.constant 0 : i32
    return %arg0, %c0_i32 : i32, i32
  }
  func.func @transform_1(%arg0: i32) -> (i32, i32) {
    %c0_i32 = arith.constant 0 : i32
    %c0_i32_0 = arith.constant 0 : i32
    %c0_i32_1 = arith.constant 0 : i32
    return %c0_i32, %c0_i32_0 : i32, i32
  }
  func.func @transform_2(%arg0: i32) -> (i32, i32) {
    %c0_i32 = arith.constant 0 : i32
    %c0_i32_0 = arith.constant 0 : i32
    %c0_i32_1 = arith.constant 0 : i32
    return %c0_i32, %c0_i32_0 : i32, i32
  }
  func.func @transform_3(%arg0: i32) -> (i32, i32) {
    %c0_i32 = arith.constant 0 : i32
    %c0_i32_0 = arith.constant 0 : i32
    %c0_i32_1 = arith.constant 0 : i32
    return %c0_i32, %c0_i32_0 : i32, i32
  }
  func.func @transform_4(%arg0: i32) -> (i32, i32) {
    %c0_i32 = arith.constant 0 : i32
    %c0_i32_0 = arith.constant 0 : i32
    %c0_i32_1 = arith.constant 0 : i32
    return %c0_i32, %c0_i32_0 : i32, i32
  }
  func.func @transform_5(%arg0: i32) -> (i32, i32) {
    %c0_i32 = arith.constant 0 : i32
    %c0_i32_0 = arith.constant 0 : i32
    return %arg0, %c0_i32 : i32, i32
  }
}

</mosaic_0001>

<bundles_post_ra>
// kernel: tpu_custom_call.1
= control target key start
LH: loop header
LB: loop body
LE: loop exit
PB: predicated region body
PF: predicated region fallthrough
CT: control target
= control target key end

     0   :  { %10 = vsyncpa [#allocation3], 0  ;;  %s1906_s0 = inlined_call_operand.hbm [shape: f32[256,256], index: 0, kind: input, shape index: {}]   ;;  %s1907_s1 = inlined_call_operand.hbm [shape: f32[256,128], index: 1, kind: input, shape index: {}]   ;;  %s1908_s2 = inlined_call_operand.vmem [shape: f32[1,128], index: 2, kind: input, shape index: {}]   ;;  %s1909_s3 = inlined_call_operand.hbm [shape: f32[128,128], index: 3, kind: input, shape index: {}]   ;;  %s1910_s4 = inlined_call_operand.vmem [shape: f32[1,128], index: 4, kind: input, shape index: {}]   ;;  %s1911_s5 = inlined_call_operand.hbm [shape: f32[256,128], index: 5, kind: output, shape index: {}]  }
   0x1   :  { %12 = vsyncpa [#allocation3 + $0x1], 0 }
   0x2   :  { %13 = vsyncpa [#allocation6], 0 }
   0x3   :  { %14 = vsyncpa [#allocation4], 0 }
   0x4   :  { %16 = vsyncpa [#allocation4 + $0x1], 0  ;;  %s1540_s18 = smov 0   ;;  %s1542_s19 = smov 0  }
   0x5   :  { %s1544_s20 = smov 0   ;;  %s1546_s21 = smov 0  }
   0x6 LB: > { %s1561_s22 = sadd.s32 4294967295, %s1498_s21   ;;  %s1021_s23 = sadd.s32 4294967294, %s1498_s21   ;;  %s1498_s21 = sphi %s1546_s21, %s1933_s21   ;;  %s1494_s20 = sphi %s1544_s20, %s1932_s20   ;;  %s1490_s19 = sphi %s1542_s19, %s1931_s19   ;;  %s1486_s18 = sphi %s1540_s18, %s1930_s18  }
   0x7   : > { %p42_p0 = scmp.ne.s32.totalorder %s1490_s19, %s1486_s18  ;;  %p1912_p1 = scmp.eq.s32.totalorder %s1561_s22, 0 }
   0x8   : > { %p156_p3 = scmp.eq.s32.totalorder %s1021_s23, 1  ;;  %p1022_p5 = scmp.ge.s32.totalorder %s1498_s21, 1 }
   0x9   : > { %p1570_p4 = por %p1912_p1, %p42_p0  ;;  %p163_p7 = scmp.lt.s32.totalorder %s1498_s21, 3 }
   0xa   : > { %p1575_p6 = por %p156_p3, %p42_p0  ;;  %s1500_s27 = smov [#allocation5]  }
   0xb   : > { %s1916_s24 = scalar_select %p1570_p4, 1, 0 }
   0xc   : > { %s1917_s25 = scalar_select %p1575_p6, 1, 0 }
   0xd   : > { %p1580_p8 = pnand %p1022_p5, %p163_p7  ;;  %s175_s28 = sshll.u32 %s1500_s27, 4  ;;  %s176_s28 = int_to_ptr.vmem [resolvable:$true] %s175_s28 }
   0xe   : > { %s1501_s30 = smov [#allocation7]   ;;  %s1361_s7 = scalar_lea.vmem %s176_s28, 4096 }
   0xf   : > { %s1918_s26 = scalar_select %p1580_p8, 1, 0 }
  0x10   : > { %p1225_p9 = pneg %p1580_p8  ;;  %s191_s6 = sshll.u32 %s1501_s30, 4  ;;  %s192_s6 = int_to_ptr.vmem [resolvable:$true] %s191_s6 }
  0x11   : > { %p1362_p13 = scmp.ne.s32.totalorder %s176_s28, %s1361_s7  ;;  %p1369_p5 = scmp.lt.s32.totalorder %s176_s28, %s176_s28 }
  0x12   : > { %p1589_p11 = pnand %p1225_p9, %p1912_p1  ;;  %p1370_p7 = scmp.lt.s32.totalorder %s1361_s7, %s1361_s7 }
  0x14   : > { %p1352_p12 = pneg %p1589_p11  ;;  %p1371_p10 = por %p1370_p7, %p1369_p5 }
  0x16   : > { %p1364_p0 = pnand %p1362_p13, %p1352_p12 }
  0x18   : > { %p1365_p3 = pneg %p1364_p0 }
  0x1a   : > { %p1372_p9 = pnand %p1371_p10, %p1365_p3 }
  0x1c   : > { %1375 = shalt.err (!%p1372_p9)
}
  0x1d   : > { %s1502_s8 = smov 128   ;;  %s1503_s9 = smov 8  }
  0x1e   : > { %1228 = dma.hbm_to_vmem [thread:$0]  (!%p1589_p11), %s1907_s1, 4096, %s176_s28, [#allocation6], %s1502_s8, %s1502_s8, %s1503_s9  }
  0x1f   : > { %s1387_s12 = scalar_lea.vmem %s192_s6, 2048  ;;  %p1395_p2 = scmp.lt.s32.totalorder %s192_s6, %s192_s6 }
  0x20   : > { %p1388_p1 = scmp.ne.s32.totalorder %s192_s6, %s1387_s12  ;;  %p1396_p6 = scmp.lt.s32.totalorder %s1387_s12, %s1387_s12 }
  0x22   : > { %p1390_p13 = pnand %p1388_p1, %p1352_p12  ;;  %p1397_p5 = por %p1396_p6, %p1395_p2 }
  0x24   : > { %p1391_p0 = pneg %p1390_p13 }
  0x26   : > { %p1398_p10 = pnand %p1397_p5, %p1391_p0 }
  0x28   : > { %1401 = shalt.err (!%p1398_p10)
}
  0x29   : > { %1231 = dma.hbm_to_vmem [thread:$0]  (!%p1589_p11), %s1909_s3, 2048, %s192_s6, [#allocation6], %s1502_s8, %s1502_s8, %s1503_s9  }
  0x2a   : > { %s1612_s15 = sadd.s32 1, %s1498_s21   ;;  %s29_s16 = sadd.s32 1, %s1494_s20 }
  0x2b   : > { %s26_s17 = ssub.s32 %s1498_s21, %s1612_s15  ;;  %p36_p1 = scmp.ne.s32.totalorder %s1494_s20, %s1490_s19 }
  0x2c   : > { %p27_p2 = scmp.eq.s32.totalorder %s26_s17, 0  ;;  %p37_p6 = scmp.eq.s32.totalorder %s1498_s21, 0 }
  0x2d   : > { %p1920_p12 = scmp.eq.s32.totalorder %s1561_s22, 1  ;;  %p1242_p7 = scmp.lt.s32.totalorder %s1498_s21, 2 }
  0x2e   : > { %s1628_s27 = scalar_select %p27_p2, %s1494_s20, %s29_s16  }
  0x2f   : > { %p1622_p3 = por %p1920_p12, %p36_p1  ;;  %p38_p9 = por %p37_p6, %p36_p1 }
  0x30   : > { %s208_s28 = sand.u32 1, %s1494_s20   ;;  %s1043_s30 = sshll.u32 %s1498_s21, 12 }
  0x31   : > { %s1921_s23 = scalar_select %p1622_p3, 1, 0 }
  0x32   : > { %s1026_s29 = sshll.u32 %s208_s28, 8  ;;  %s1635_s8 = scalar_lea.hbm %s1906_s0, %s1043_s30 }
  0x33   : > { %s212_s9 = scalar_lea.vmem [#allocation2], %s1026_s29  ;;  %p1639_p11 = pnand %p1242_p7, %p38_p9 }
  0x34   : > { %s220_s10 = sshll.u32 %s212_s9, 4  ;;  %s1643_s12 = scalar_lea.sflag [#allocation3], %s208_s28  ;;  %s1637_s10 = int_to_ptr.vmem [resolvable:$true] %s220_s10 }
  0x35   : > { %s1402_s13 = scalar_lea.hbm %s1635_s8, 4096  ;;  %p1404_p0 = pneg %p1639_p11 }
  0x36   : > { %p1403_p13 = scmp.ne.s32.totalorder %s1635_s8, %s1402_s13  ;;  %s1407_s17 = scalar_lea.hbm %s1906_s0, 8192 }
  0x37   : > { %p1408_p1 = scmp.lt.s32.totalorder %s1635_s8, %s1906_s0  ;;  %p1409_p2 = scmp.lt.s32.totalorder %s1407_s17, %s1402_s13 }
  0x38   : > { %p1405_p5 = pnand %p1404_p0, %p1403_p13 }
  0x39   : > { %p1410_p6 = por %p1409_p2, %p1408_p1 }
  0x3a   : > { %p1406_p10 = pneg %p1405_p5 }
  0x3c   : > { %p1411_p12 = pnand %p1410_p6, %p1406_p10 }
  0x3e   : > { %1414 = shalt.err (!%p1411_p12)
}
  0x3f   : > { %s1415_s28 = scalar_lea.vmem %s1637_s10, 4096  ;;  %s1504_s6 = smov [#allocation2]  }
  0x40   : > { %p1416_p7 = scmp.ne.s32.totalorder %s1637_s10, %s1415_s28  ;;  %s1420_s7 = sshll.u32 %s1504_s6, 4  ;;  %s1421_s7 = int_to_ptr.vmem [resolvable:$false] %s1420_s7 }
  0x41   : > { %s1422_s9 = scalar_lea.vmem %s1421_s7, 8192  ;;  %p1423_p5 = scmp.lt.s32.totalorder %s1637_s10, %s1421_s7 }
  0x42   : > { %p1418_p9 = pnand %p1416_p7, %p1404_p0  ;;  %p1424_p3 = scmp.lt.s32.totalorder %s1422_s9, %s1415_s28 }
  0x44   : > { %p1419_p13 = pneg %p1418_p9  ;;  %p1425_p4 = por %p1424_p3, %p1423_p5 }
  0x46   : > { %p1426_p8 = pnand %p1425_p4, %p1419_p13 }
  0x48   : > { %1429 = shalt.err (!%p1426_p8)
}
  0x49   : > { %s1505_s13 = smov 256   ;;  %s1506_s14 = smov 16  }
  0x4a   : > { %1235 = dma.hbm_to_vmem [thread:$0]  (!%p1639_p11), %s1635_s8, 4096, %s1637_s10, %s1643_s12, %s1505_s13, %s1505_s13, %s1506_s14  }
  0x4b   : > { %p1923_p0 = scmp.ne.s32.totalorder %s1918_s26, 0 }
  0x4c   : > { %s1667_s16 = sand.u32 (!%p1923_p0), 1, %s1490_s19   ;;  %p1924_p4 = scmp.ne.s32.totalorder (!%p1923_p0), %s1916_s24, 0 }
  0x4d   : > { %232 = sbr.rel (%p1923_p0) target bundleno = 908 (0x38c), region = 40  ;;  %s1031_s17 = sshll.u32 (!%p1923_p0), %s1667_s16, 8 }
  0x4e   : > { %s235_s29 = scalar_lea.sflag (!%p1923_p0), [#allocation3], %s1667_s16  ;;  %s1671_s30 = scalar_lea.vmem (!%p1923_p0), [#allocation2], %s1031_s17 }
  0x52   : > { %1473 = dma.done.wait (%p1924_p4), %s235_s29, 4096  }
  0x53   : > { %1475 = vsyncadd (%p1924_p4), %s235_s29, 4294963200  ;;  %p1925_p8 = scmp.eq.s32.totalorder %s1561_s22, 0 }
  0x55   : > { %1477 = dma.done.wait (%p1925_p8), [#allocation6], 6144   ;;  %p1926_p3 = pmov %p1925_p8 }
  0x56   : > { %v338_v0 = vld [vmem:[#allocation5 + $0xf8] sm:$0xff]  ;;  %v337_v2 = vld [vmem:[#allocation5 + $0xf0] sm:$0xff]  ;;  %v336_v4 = vld [vmem:[#allocation5 + $0xe8] sm:$0xff]  ;;  %s1034_s11 = sshll.u32 %s1667_s16, 7  ;;  %s1044_s28 = sshll.u32 %s1561_s22, 11 }
  0x57   : > { %1479 = vsyncadd (%p1926_p3), [#allocation6], 4294961152  ;;  %v322_v1 = vld [vmem:[#allocation5 + $0x78] sm:$0xff]  ;;  %1045 = vmatprep.subr.mxu0 %v338_v0  ;;  %v321_v3 = vld [vmem:[#allocation5 + $0x70] sm:$0xff]  ;;  %s1823_s12 = scalar_lea.vmem [#allocation8], %s1034_s11  ;;  %s1858_s13 = scalar_lea.hbm %s1911_s5, %s1044_s28 }
  0x58   : > { %1046 = vmatpush3.msra.mxu0 %v322_v1  ;;  %v320_v5 = vld [vmem:[#allocation5 + $0x68] sm:$0xff]  ;;  %v335_v6 = vld [vmem:[#allocation5 + $0xe0] sm:$0xff]  ;;  %v334_v8 = vld [vmem:[#allocation5 + $0xd8] sm:$0xff]  ;;  %s929_s6 = sshll.u32 %s1823_s12, 4  ;;  %s916_s14 = scalar_lea.sflag [#allocation4], %s1667_s16  ;;  %s1860_s6 = int_to_ptr.vmem [resolvable:$true] %s929_s6 }
  0x59   : > { %1047 = vmatprep.subr.mxu0 %v337_v2  ;;  %v319_v7 = vld [vmem:[#allocation5 + $0x60] sm:$0xff]  ;;  %v318_v9 = vld [vmem:[#allocation5 + $0x58] sm:$0xff]  ;;  %v333_v10 = vld [vmem:[#allocation5 + $0xd0] sm:$0xff]  ;;  %s1430_s22 = scalar_lea.vmem %s1860_s6, 2048  ;;  %p1927_p10 = scmp.ne.s32.totalorder %s1921_s23, 0 }
  0x5a   : > { %1048 = vmatpush3.msra.mxu0 %v321_v3  ;;  %v317_v11 = vld [vmem:[#allocation5 + $0x50] sm:$0xff]  ;;  %v332_v12 = vld [vmem:[#allocation5 + $0xc8] sm:$0xff]  ;;  %v331_v15 = vld [vmem:[#allocation5 + $0xc0] sm:$0xff]  ;;  %p1431_p11 = scmp.ne.s32.totalorder %s1860_s6, %s1430_s22  ;;  %s1507_s17 = smov [#allocation8]  }
  0x5b   : > { %1049 = vmatprep.subr.mxu0 %v336_v4  ;;  %v276_v13 = vld [vmem:[%s1671_s30 + $0x8] sm:$0xff]  ;;  %v315_v16 = vld [vmem:[#allocation5 + $0x40] sm:$0xff]  ;;  %v330_v17 = vld [vmem:[#allocation5 + $0xb8] sm:$0xff]  ;;  %s1434_s29 = sshll.u32 %s1507_s17, 4  ;;  %s1435_s29 = int_to_ptr.vmem [resolvable:$false] %s1434_s29 }
  0x5c   : > { %1050 = vmatpush3.msra.mxu0 %v320_v5  ;;  %v316_v14 = vld [vmem:[#allocation5 + $0x48] sm:$0xff]  ;;  %410 = vmatprep.mubr.f32.mxu0 %v276_v13  ;;  %v314_v18 = vld [vmem:[#allocation5 + $0x38] sm:$0xff]  ;;  %v329_v19 = vld [vmem:[#allocation5 + $0xb0] sm:$0xff]  ;;  %p1432_p1 = pnand %p1431_p11, %p1927_p10  ;;  %p1437_p6 = scmp.lt.s32.totalorder %s1860_s6, %s1435_s29 }
  0x5d   : > { %1051 = vmatprep.subr.mxu0 %v335_v6  ;;  %v313_v20 = vld [vmem:[#allocation5 + $0x30] sm:$0xff]  ;;  %v328_v21 = vld [vmem:[#allocation5 + $0xa8] sm:$0xff]  ;;  %v327_v23 = vld [vmem:[#allocation5 + $0xa0] sm:$0xff] }
  0x5e   : > { %1052 = vmatpush3.msra.mxu0 %v319_v7  ;;  %v312_v22 = vld [vmem:[#allocation5 + $0x28] sm:$0xff]  ;;  %v311_v24 = vld [vmem:[#allocation5 + $0x20] sm:$0xff]  ;;  %v554_v25 = vld [vmem:[#allocation7 + $0x78] sm:$0xff]  ;;  %p1433_p2 = pneg %p1432_p1 }
  0x5f   : > { %1053 = vmatprep.subr.mxu0 %v334_v8  ;;  %v553_v26 = vld [vmem:[#allocation7 + $0x70] sm:$0xff]  ;;  %v326_v27 = vld [vmem:[#allocation5 + $0x98] sm:$0xff]  ;;  %1157 = vmatprep.subr.mxu1 %v554_v25  ;;  %v552_v29 = vld [vmem:[#allocation7 + $0x68] sm:$0xff] }
  0x60   : > { %1054 = vmatpush3.msra.mxu0 %v318_v9  ;;  %v310_v28 = vld [vmem:[#allocation5 + $0x18] sm:$0xff]  ;;  %1158 = vmatpush3.msra.mxu1 %v554_v25  ;;  %v325_v30 = vld [vmem:[#allocation5 + $0x90] sm:$0xff]  ;;  %v551_v32 = vld [vmem:[#allocation7 + $0x60] sm:$0xff] }
  0x61   : > { %1055 = vmatprep.subr.mxu0 %v333_v10  ;;  %1159 = vmatprep.subr.mxu1 %v553_v26  ;;  %v309_v31 = vld [vmem:[#allocation5 + $0x10] sm:$0xff]  ;;  %v324_v33 = vld [vmem:[#allocation5 + $0x88] sm:$0xff]  ;;  %v550_v35 = vld [vmem:[#allocation7 + $0x58] sm:$0xff] }
  0x62   : > { %1056 = vmatpush3.msra.mxu0 %v317_v11  ;;  %1160 = vmatpush3.msra.mxu1 %v553_v26  ;;  %v308_v34 = vld [vmem:[#allocation5 + $0x8] sm:$0xff]  ;;  %v323_v36 = vld [vmem:[#allocation5 + $0x80] sm:$0xff]  ;;  %v549_v38 = vld [vmem:[#allocation7 + $0x50] sm:$0xff] }
  0x63   : > { %1057 = vmatprep.subr.mxu0 %v332_v12  ;;  %1161 = vmatprep.subr.mxu1 %v552_v29  ;;  %v307_v37 = vld [vmem:[#allocation5] sm:$0xff]  ;;  %v278_v40 = vld [vmem:[%s1671_s30 + $0x18] sm:$0xff]  ;;  %v548_v41 = vld [vmem:[#allocation7 + $0x48] sm:$0xff] }
  0x64   : > { %1058 = vmatpush3.msra.mxu0 %v316_v14  ;;  %1162 = vmatpush3.msra.mxu1 %v552_v29  ;;  %v275_v39 = vld [vmem:[%s1671_s30] sm:$0xff]  ;;  %v277_v43 = vld [vmem:[%s1671_s30 + $0x10] sm:$0xff]  ;;  %v280_v44 = vld [vmem:[%s1671_s30 + $0x28] sm:$0xff] }
  0x65   : > { %1059 = vmatprep.subr.mxu0 %v331_v15  ;;  %1163 = vmatprep.subr.mxu1 %v551_v32  ;;  %v547_v42 = vld [vmem:[#allocation7 + $0x40] sm:$0xff]  ;;  %v546_v45 = vld [vmem:[#allocation7 + $0x38] sm:$0xff]  ;;  %v281_v48 = vld [vmem:[%s1671_s30 + $0x30] sm:$0xff] }
  0x66   : > { %1060 = vmatpush3.msra.mxu0 %v315_v16  ;;  %1164 = vmatpush3.msra.mxu1 %v551_v32  ;;  %v279_v46 = vld [vmem:[%s1671_s30 + $0x20] sm:$0xff]  ;;  %v282_v47 = vld [vmem:[%s1671_s30 + $0x38] sm:$0xff]  ;;  %v284_v49 = vld [vmem:[%s1671_s30 + $0x48] sm:$0xff] }
  0x67   : > { %1061 = vmatprep.subr.mxu0 %v330_v17  ;;  %1165 = vmatprep.subr.mxu1 %v550_v35  ;;  %v283_v50 = vld [vmem:[%s1671_s30 + $0x40] sm:$0xff]  ;;  %v286_v51 = vld [vmem:[%s1671_s30 + $0x58] sm:$0xff]  ;;  %v285_v52 = vld [vmem:[%s1671_s30 + $0x50] sm:$0xff] }
  0x68   : > { %1062 = vmatpush3.msra.mxu0 %v314_v18  ;;  %1166 = vmatpush3.msra.mxu1 %v550_v35  ;;  %v288_v53 = vld [vmem:[%s1671_s30 + $0x68] sm:$0xff]  ;;  %v287_v54 = vld [vmem:[%s1671_s30 + $0x60] sm:$0xff]  ;;  %v290_v55 = vld [vmem:[%s1671_s30 + $0x78] sm:$0xff] }
  0x69   : > { %1063 = vmatprep.subr.mxu0 %v329_v19  ;;  %1167 = vmatprep.subr.mxu1 %v549_v38  ;;  %v289_v56 = vld [vmem:[%s1671_s30 + $0x70] sm:$0xff]  ;;  %v292_v57 = vld [vmem:[%s1671_s30 + $0x88] sm:$0xff]  ;;  %v291_v58 = vld [vmem:[%s1671_s30 + $0x80] sm:$0xff] }
  0x6a   : > { %1064 = vmatpush3.msra.mxu0 %v313_v20  ;;  %1168 = vmatpush3.msra.mxu1 %v549_v38  ;;  %v294_v59 = vld [vmem:[%s1671_s30 + $0x98] sm:$0xff]  ;;  %v293_v60 = vld [vmem:[%s1671_s30 + $0x90] sm:$0xff]  ;;  %v296_v61 = vld [vmem:[%s1671_s30 + $0xa8] sm:$0xff] }
  0x6b   : > { %1065 = vmatprep.subr.mxu0 %v328_v21  ;;  %1169 = vmatprep.subr.mxu1 %v548_v41  ;;  %v295_v62 = vld [vmem:[%s1671_s30 + $0xa0] sm:$0xff]  ;;  %v298_v63 = vld [vmem:[%s1671_s30 + $0xb8] sm:$0xff]  ;;  %v297_v0 = vld [vmem:[%s1671_s30 + $0xb0] sm:$0xff] }
  0x6c   : > { %1066 = vmatpush3.msra.mxu0 %v312_v22  ;;  %1170 = vmatpush3.msra.mxu1 %v548_v41  ;;  %v300_v1 = vld [vmem:[%s1671_s30 + $0xc8] sm:$0xff]  ;;  %v299_v2 = vld [vmem:[%s1671_s30 + $0xc0] sm:$0xff]  ;;  %v302_v3 = vld [vmem:[%s1671_s30 + $0xd8] sm:$0xff] }
  0x6d   : > { %1067 = vmatprep.subr.mxu0 %v327_v23  ;;  %1171 = vmatprep.subr.mxu1 %v547_v42  ;;  %v301_v4 = vld [vmem:[%s1671_s30 + $0xd0] sm:$0xff]  ;;  %v304_v5 = vld [vmem:[%s1671_s30 + $0xe8] sm:$0xff]  ;;  %v303_v6 = vld [vmem:[%s1671_s30 + $0xe0] sm:$0xff] }
  0x6e   : > { %1068 = vmatpush3.msra.mxu0 %v311_v24  ;;  %1172 = vmatpush3.msra.mxu1 %v547_v42  ;;  %v306_v7 = vld [vmem:[%s1671_s30 + $0xf8] sm:$0xff]  ;;  %v305_v8 = vld [vmem:[%s1671_s30 + $0xf0] sm:$0xff]  ;;  %v544_v10 = vld [vmem:[#allocation7 + $0x28] sm:$0xff]  ;;  %s1436_s30 = scalar_lea.vmem %s1435_s29, 4096 }
  0x6f   : > { %1069 = vmatprep.subr.mxu0 %v326_v27  ;;  %1173 = vmatprep.subr.mxu1 %v546_v45  ;;  %v545_v9 = vld [vmem:[#allocation7 + $0x30] sm:$0xff]  ;;  %v543_v11 = vld [vmem:[#allocation7 + $0x20] sm:$0xff]  ;;  %v542_v12 = vld [vmem:[#allocation7 + $0x18] sm:$0xff]  ;;  %p1438_p12 = scmp.lt.s32.totalorder %s1436_s30, %s1430_s22 }
  0x70   : > { %1070 = vmatpush3.msra.mxu0 %v310_v28  ;;  %1174 = vmatpush3.msra.mxu1 %v546_v45  ;;  %v541_v13 = vld [vmem:[#allocation7 + $0x10] sm:$0xff]  ;;  %v540_v14 = vld [vmem:[#allocation7 + $0x8] sm:$0xff]  ;;  %v539_v15 = vld [vmem:[#allocation7] sm:$0xff] }
  0x71   : > { %1071 = vmatprep.subr.mxu0 %v325_v30  ;;  %1175 = vmatprep.subr.mxu1 %v545_v9  ;;  %v1716_v17 = vld [vmem:[%s1908_s2] ss:$0 sm:$0xff]  ;;  %p1439_p7 = por %p1438_p12, %p1437_p6 }
  0x72   : > { %1072 = vmatpush3.msra.mxu0 %v309_v31  ;;  %1176 = vmatpush3.msra.mxu1 %v545_v9 }
  0x73   : > { %1073 = vmatprep.subr.mxu0 %v324_v33  ;;  %1177 = vmatprep.subr.mxu1 %v544_v10  ;;  %p1440_p9 = pnand %p1439_p7, %p1433_p2 }
  0x74   : > { %1074 = vmatpush3.msra.mxu0 %v308_v34  ;;  %1178 = vmatpush3.msra.mxu1 %v544_v10 }
  0x75   : > { %1075 = vmatprep.subr.mxu0 %v323_v36  ;;  %1179 = vmatprep.subr.mxu1 %v543_v11 }
  0x76   : > { %1076 = vmatpush3.msra.mxu0 %v307_v37  ;;  %1180 = vmatpush3.msra.mxu1 %v543_v11 }
  0x77   : > { %411 = vmatmul.mubr.f32.vlgmr.msra.gmra.mxu0 %v275_v39  ;;  %1181 = vmatprep.subr.mxu1 %v542_v12 }
  0x78   : > { %415 = vmatprep.mubr.f32.mxu0 %v278_v40  ;;  %1182 = vmatpush3.msra.mxu1 %v542_v12 }
  0x79   : > { %1183 = vmatprep.subr.mxu1 %v541_v13 }
  0x7a   : > { %1184 = vmatpush3.msra.mxu1 %v541_v13 }
  0x7b   : > { %416 = vmatmul.mubr.f32.gmra.mxu0 %v277_v43  ;;  %1185 = vmatprep.subr.mxu1 %v540_v14 }
  0x7c   : > { %420 = vmatprep.mubr.f32.mxu0 %v280_v44  ;;  %1186 = vmatpush3.msra.mxu1 %v540_v14 }
  0x7d   : > { %1187 = vmatprep.subr.mxu1 %v539_v15 }
  0x7e   : > { %1188 = vmatpush3.msra.mxu1 %v539_v15 }
  0x7f   : > { %421 = vmatmul.mubr.f32.gmra.mxu0 %v279_v46 }
  0x80   : > { %425 = vmatprep.mubr.f32.mxu0 %v282_v47 }
  0x83   : > { %426 = vmatmul.mubr.f32.gmra.mxu0 %v281_v48 }
  0x84   : > { %430 = vmatprep.mubr.f32.mxu0 %v284_v49 }
  0x87   : > { %431 = vmatmul.mubr.f32.gmra.mxu0 %v283_v50 }
  0x88   : > { %435 = vmatprep.mubr.f32.mxu0 %v286_v51 }
  0x8b   : > { %436 = vmatmul.mubr.f32.gmra.mxu0 %v285_v52 }
  0x8c   : > { %440 = vmatprep.mubr.f32.mxu0 %v288_v53 }
  0x8f   : > { %441 = vmatmul.mubr.f32.gmra.mxu0 %v287_v54 }
  0x90   : > { %445 = vmatprep.mubr.f32.mxu0 %v290_v55 }
  0x93   : > { %446 = vmatmul.mubr.f32.gmra.mxu0 %v289_v56 }
  0x94   : > { %450 = vmatprep.mubr.f32.mxu0 %v292_v57 }
  0x97   : > { %451 = vmatmul.mubr.f32.gmra.mxu0 %v291_v58 }
  0x98   : > { %455 = vmatprep.mubr.f32.mxu0 %v294_v59 }
  0x9b   : > { %456 = vmatmul.mubr.f32.gmra.mxu0 %v293_v60 }
  0x9c   : > { %460 = vmatprep.mubr.f32.mxu0 %v296_v61 }
  0x9f   : > { %461 = vmatmul.mubr.f32.gmra.mxu0 %v295_v62 }
  0xa0   : > { %465 = vmatprep.mubr.f32.mxu0 %v298_v63 }
  0xa3   : > { %466 = vmatmul.mubr.f32.gmra.mxu0 %v297_v0 }
  0xa4   : > { %470 = vmatprep.mubr.f32.mxu0 %v300_v1 }
  0xa7   : > { %471 = vmatmul.mubr.f32.gmra.mxu0 %v299_v2 }
  0xa8   : > { %475 = vmatprep.mubr.f32.mxu0 %v302_v3 }
  0xab   : > { %476 = vmatmul.mubr.f32.gmra.mxu0 %v301_v4 }
  0xac   : > { %480 = vmatprep.mubr.f32.mxu0 %v304_v5 }
  0xaf   : > { %481 = vmatmul.mubr.f32.gmra.mxu0 %v303_v6 }
  0xb0   : > { %485 = vmatprep.mubr.f32.mxu0 %v306_v7 }
  0xb3   : > { %486 = vmatmul.mubr.f32.gmra.mxu0 %v305_v8 }
 0x137   : > { %v1077_v16 = vpop.f32.mrf.mxu0 }
 0x139   : > { %v1078_v18 = vpop.f32.mrf.mxu0 }
 0x13a   : > { %v1079_v19 = vadd.f32 %v1078_v18, %v1077_v16 }
 0x13b   : > { %v1080_v20 = vpop.f32.mrf.mxu0 }
 0x13c   : > { %v413_v21 = vadd.f32 %v1079_v19, %v1716_v17 }
 0x13d   : > { %v1081_v22 = vpop.f32.mrf.mxu0 }
 0x13e   : > { %v1082_v23 = vadd.f32 %v1081_v22, %v1080_v20  ;;  %vm491_vm0 = vcmp.ge.f32.partialorder %v413_v21, 0.0  ;;  %v507_v24 = vmul.f32 0.01, %v413_v21 }
 0x13f   : > { %v1083_v25 = vpop.f32.mrf.mxu0 }
 0x140   : > { %v418_v26 = vadd.f32 %v1082_v23, %v1716_v17  ;;  %v523_v27 = vsel %vm491_vm0, %v413_v21, %v507_v24 }
 0x141   : > { %v1084_v28 = vpop.f32.mrf.mxu0  ;;  %1189 = vmatprep.mubr.f32.mxu1 %v523_v27 }
 0x142   : > { %v1085_v29 = vadd.f32 %v1084_v28, %v1083_v25  ;;  %vm492_vm1 = vcmp.ge.f32.partialorder %v418_v26, 0.0  ;;  %v508_v30 = vmul.f32 0.01, %v418_v26 }
 0x143   : > { %v1086_v31 = vpop.f32.mrf.mxu0 }
 0x144   : > { %v423_v32 = vadd.f32 %v1085_v29, %v1716_v17  ;;  %v524_v33 = vsel %vm492_vm1, %v418_v26, %v508_v30 }
 0x145   : > { %v1087_v34 = vpop.f32.mrf.mxu0  ;;  %1190 = vmatmul.mubr.f32.vlgmr.msra.gmra.mxu1 %v524_v33 }
 0x146   : > { %v1088_v35 = vadd.f32 %v1087_v34, %v1086_v31  ;;  %vm493_vm2 = vcmp.ge.f32.partialorder %v423_v32, 0.0  ;;  %v509_v36 = vmul.f32 0.01, %v423_v32 }
 0x147   : > { %v1089_v37 = vpop.f32.mrf.mxu0 }
 0x148   : > { %v428_v38 = vadd.f32 %v1088_v35, %v1716_v17  ;;  %v525_v39 = vsel %vm493_vm2, %v423_v32, %v509_v36 }
 0x149   : > { %v1090_v40 = vpop.f32.mrf.mxu0  ;;  %1192 = vmatprep.mubr.f32.mxu1 %v525_v39 }
 0x14a   : > { %v1091_v41 = vadd.f32 %v1090_v40, %v1089_v37  ;;  %vm494_vm3 = vcmp.ge.f32.partialorder %v428_v38, 0.0  ;;  %v510_v42 = vmul.f32 0.01, %v428_v38 }
 0x14b   : > { %v1092_v43 = vpop.f32.mrf.mxu0 }
 0x14c   : > { %v433_v44 = vadd.f32 %v1091_v41, %v1716_v17  ;;  %v526_v45 = vsel %vm494_vm3, %v428_v38, %v510_v42 }
 0x14d   : > { %v1093_v46 = vpop.f32.mrf.mxu0  ;;  %1193 = vmatmul.mubr.f32.gmra.mxu1 %v526_v45 }
 0x14e   : > { %v1094_v47 = vadd.f32 %v1093_v46, %v1092_v43  ;;  %vm495_vm4 = vcmp.ge.f32.partialorder %v433_v44, 0.0  ;;  %v511_v48 = vmul.f32 0.01, %v433_v44 }
 0x14f   : > { %v1095_v49 = vpop.f32.mrf.mxu0 }
 0x150   : > { %v438_v50 = vadd.f32 %v1094_v47, %v1716_v17  ;;  %v527_v51 = vsel %vm495_vm4, %v433_v44, %v511_v48 }
 0x151   : > { %v1096_v52 = vpop.f32.mrf.mxu0  ;;  %1195 = vmatprep.mubr.f32.mxu1 %v527_v51 }
 0x152   : > { %v1097_v53 = vadd.f32 %v1096_v52, %v1095_v49  ;;  %vm496_vm5 = vcmp.ge.f32.partialorder %v438_v50, 0.0  ;;  %v512_v54 = vmul.f32 0.01, %v438_v50 }
 0x153   : > { %v1098_v55 = vpop.f32.mrf.mxu0 }
 0x154   : > { %v443_v56 = vadd.f32 %v1097_v53, %v1716_v17  ;;  %v528_v57 = vsel %vm496_vm5, %v438_v50, %v512_v54  ;;  %v1036_v50 = vld [vmem:[%s1910_s4] ss:$0 sm:$0xff] }
 0x155   : > { %v1099_v58 = vpop.f32.mrf.mxu0  ;;  %1196 = vmatmul.mubr.f32.gmra.mxu1 %v528_v57 }
 0x156   : > { %v1100_v59 = vadd.f32 %v1099_v58, %v1098_v55  ;;  %vm497_vm6 = vcmp.ge.f32.partialorder %v443_v56, 0.0  ;;  %v513_v60 = vmul.f32 0.01, %v443_v56 }
 0x157   : > { %v1101_v61 = vpop.f32.mrf.mxu0 }
 0x158   : > { %v448_v62 = vadd.f32 %v1100_v59, %v1716_v17  ;;  %v529_v63 = vsel %vm497_vm6, %v443_v56, %v513_v60 }
 0x159   : > { %v1102_v0 = vpop.f32.mrf.mxu0  ;;  %1198 = vmatprep.mubr.f32.mxu1 %v529_v63 }
 0x15a   : > { %v1103_v1 = vadd.f32 %v1102_v0, %v1101_v61  ;;  %vm498_vm7 = vcmp.ge.f32.partialorder %v448_v62, 0.0  ;;  %v514_v2 = vmul.f32 0.01, %v448_v62 }
 0x15b   : > { %v1104_v3 = vpop.f32.mrf.mxu0 }
 0x15c   : > { %v453_v4 = vadd.f32 %v1103_v1, %v1716_v17  ;;  %v530_v5 = vsel %vm498_vm7, %v448_v62, %v514_v2 }
 0x15d   : > { %v1105_v6 = vpop.f32.mrf.mxu0  ;;  %1199 = vmatmul.mubr.f32.gmra.mxu1 %v530_v5 }
 0x15e   : > { %v1106_v7 = vadd.f32 %v1105_v6, %v1104_v3  ;;  %vm499_vm8 = vcmp.ge.f32.partialorder %v453_v4, 0.0  ;;  %v515_v8 = vmul.f32 0.01, %v453_v4 }
 0x15f   : > { %v1107_v9 = vpop.f32.mrf.mxu0 }
 0x160   : > { %v458_v10 = vadd.f32 %v1106_v7, %v1716_v17  ;;  %v531_v11 = vsel %vm499_vm8, %v453_v4, %v515_v8 }
 0x161   : > { %v1108_v12 = vpop.f32.mrf.mxu0  ;;  %1201 = vmatprep.mubr.f32.mxu1 %v531_v11 }
 0x162   : > { %v1109_v13 = vadd.f32 %v1108_v12, %v1107_v9  ;;  %vm500_vm9 = vcmp.ge.f32.partialorder %v458_v10, 0.0  ;;  %v516_v14 = vmul.f32 0.01, %v458_v10 }
 0x163   : > { %v1110_v15 = vpop.f32.mrf.mxu0 }
 0x164   : > { %v463_v16 = vadd.f32 %v1109_v13, %v1716_v17  ;;  %v532_v18 = vsel %vm500_vm9, %v458_v10, %v516_v14 }
 0x165   : > { %v1111_v19 = vpop.f32.mrf.mxu0  ;;  %1202 = vmatmul.mubr.f32.gmra.mxu1 %v532_v18 }
 0x166   : > { %v1112_v20 = vadd.f32 %v1111_v19, %v1110_v15  ;;  %vm501_vm10 = vcmp.ge.f32.partialorder %v463_v16, 0.0  ;;  %v517_v21 = vmul.f32 0.01, %v463_v16 }
 0x167   : > { %v1113_v22 = vpop.f32.mrf.mxu0 }
 0x168   : > { %v468_v23 = vadd.f32 %v1112_v20, %v1716_v17  ;;  %v533_v24 = vsel %vm501_vm10, %v463_v16, %v517_v21 }
 0x169   : > { %v1114_v25 = vpop.f32.mrf.mxu0  ;;  %1204 = vmatprep.mubr.f32.mxu1 %v533_v24 }
 0x16a   : > { %v1115_v26 = vadd.f32 %v1114_v25, %v1113_v22  ;;  %vm502_vm11 = vcmp.ge.f32.partialorder %v468_v23, 0.0  ;;  %v518_v27 = vmul.f32 0.01, %v468_v23 }
 0x16b   : > { %v1116_v28 = vpop.f32.mrf.mxu0 }
 0x16c   : > { %v473_v29 = vadd.f32 %v1115_v26, %v1716_v17  ;;  %v534_v30 = vsel %vm502_vm11, %v468_v23, %v518_v27 }
 0x16d   : > { %v1117_v31 = vpop.f32.mrf.mxu0  ;;  %1205 = vmatmul.mubr.f32.gmra.mxu1 %v534_v30 }
 0x16e   : > { %v1118_v32 = vadd.f32 %v1117_v31, %v1116_v28  ;;  %vm503_vm12 = vcmp.ge.f32.partialorder %v473_v29, 0.0  ;;  %v519_v33 = vmul.f32 0.01, %v473_v29 }
 0x16f   : > { %v1119_v34 = vpop.f32.mrf.mxu0 }
 0x170   : > { %v478_v35 = vadd.f32 %v1118_v32, %v1716_v17  ;;  %v535_v36 = vsel %vm503_vm12, %v473_v29, %v519_v33 }
 0x171   : > { %v1120_v37 = vpop.f32.mrf.mxu0  ;;  %1207 = vmatprep.mubr.f32.mxu1 %v535_v36 }
 0x172   : > { %v1121_v38 = vadd.f32 %v1120_v37, %v1119_v34  ;;  %vm504_vm13 = vcmp.ge.f32.partialorder %v478_v35, 0.0  ;;  %v520_v39 = vmul.f32 0.01, %v478_v35 }
 0x173   : > { %v1122_v40 = vpop.f32.mrf.mxu0 }
 0x174   : > { %v483_v41 = vadd.f32 %v1121_v38, %v1716_v17  ;;  %v536_v42 = vsel %vm504_vm13, %v478_v35, %v520_v39 }
 0x175   : > { %v1123_v43 = vpop.f32.mrf.mxu0  ;;  %1208 = vmatmul.mubr.f32.gmra.mxu1 %v536_v42 }
 0x176   : > { %v1124_v44 = vadd.f32 %v1123_v43, %v1122_v40  ;;  %vm505_vm14 = vcmp.ge.f32.partialorder %v483_v41, 0.0  ;;  %v521_v45 = vmul.f32 0.01, %v483_v41 }
 0x178   : > { %v488_v46 = vadd.f32 %v1124_v44, %v1716_v17  ;;  %v537_v47 = vsel %vm505_vm14, %v483_v41, %v521_v45 }
 0x179   : > { %1210 = vmatprep.mubr.f32.mxu1 %v537_v47 }
 0x17a   : > { %vm506_vm15 = vcmp.ge.f32.partialorder %v488_v46, 0.0  ;;  %v522_v48 = vmul.f32 0.01, %v488_v46 }
 0x17c   : > { %v538_v49 = vsel %vm506_vm15, %v488_v46, %v522_v48 }
 0x17d   : > { %1211 = vmatmul.mubr.f32.gmra.mxu1 %v538_v49 }
 0x205   : > { %v1191_v51 = vpop.f32.mrf.mxu1 }
 0x206   : > { %v634_v52 = vadd.f32 %v1191_v51, %v1036_v50 }
 0x207   : > { %v628_v53 = vpop.f32.mrf.mxu1 }
 0x208   : > { %709 = vmax.xlane.f32.xlu0 %v634_v52  ;;  %v629_v54 = vadd.f32 %v1036_v50, %v628_v53 }
 0x20c   : > { %707 = vmax.xlane.f32.xlu0 %v629_v54 }
 0x20d   : > { %v1194_v55 = vpop.f32.mrf.mxu1 }
 0x20e   : > { %v644_v56 = vadd.f32 %v1194_v55, %v1036_v50 }
 0x20f   : > { %v638_v57 = vpop.f32.mrf.mxu1 }
 0x210   : > { %713 = vmax.xlane.f32.xlu1 %v644_v56  ;;  %v639_v17 = vadd.f32 %v1036_v50, %v638_v57 }
 0x214   : > { %711 = vmax.xlane.f32.xlu1 %v639_v17 }
 0x215   : > { %v1197_v58 = vpop.f32.mrf.mxu1 }
 0x216   : > { %v654_v59 = vadd.f32 %v1197_v58, %v1036_v50 }
 0x217   : > { %v648_v60 = vpop.f32.mrf.mxu1 }
 0x218   : > { %v649_v61 = vadd.f32 %v1036_v50, %v648_v60  ;;  %717 = vmax.xlane.f32.xlu1 %v654_v59 }
 0x21a   : > { %715 = vmax.xlane.f32.xlu0 %v649_v61 }
 0x21d   : > { %v1200_v62 = vpop.f32.mrf.mxu1 }
 0x21e   : > { %v664_v63 = vadd.f32 %v1200_v62, %v1036_v50 }
 0x21f   : > { %v658_v0 = vpop.f32.mrf.mxu1 }
 0x220   : > { %v1737_v1 = vadd.f32 %v1036_v50, %v658_v0  ;;  %721 = vmax.xlane.f32.xlu1 %v664_v63 }
 0x222   : > { %719 = vmax.xlane.f32.xlu0 %v1737_v1 }
 0x225   : > { %v1203_v2 = vpop.f32.mrf.mxu1 }
 0x226   : > { %v1740_v3 = vadd.f32 %v1203_v2, %v1036_v50 }
 0x227   : > { %v668_v4 = vpop.f32.mrf.mxu1 }
 0x228   : > { %v1742_v5 = vadd.f32 %v1036_v50, %v668_v4  ;;  %725 = vmax.xlane.f32.xlu1 %v1740_v3 }
 0x22a   : > { %723 = vmax.xlane.f32.xlu0 %v1742_v5 }
 0x22d   : > { %v1206_v6 = vpop.f32.mrf.mxu1 }
 0x22e   : > { %v1746_v7 = vadd.f32 %v1206_v6, %v1036_v50 }
 0x22f   : > { %v678_v8 = vpop.f32.mrf.mxu1 }
 0x230   : > { %v1748_v9 = vadd.f32 %v1036_v50, %v678_v8  ;;  %729 = vmax.xlane.f32.xlu1 %v1746_v7 }
 0x232   : > { %727 = vmax.xlane.f32.xlu0 %v1748_v9 }
 0x235   : > { %v1209_v10 = vpop.f32.mrf.mxu1 }
 0x236   : > { %v1752_v11 = vadd.f32 %v1209_v10, %v1036_v50 }
 0x237   : > { %v688_v12 = vpop.f32.mrf.mxu1 }
 0x238   : > { %v1754_v13 = vadd.f32 %v1036_v50, %v688_v12  ;;  %733 = vmax.xlane.f32.xlu1 %v1752_v11 }
 0x23a   : > { %731 = vmax.xlane.f32.xlu0 %v1754_v13 }
 0x23d   : > { %v1212_v14 = vpop.f32.mrf.mxu1 }
 0x23e   : > { %v1758_v15 = vadd.f32 %v1212_v14, %v1036_v50 }
 0x23f   : > { %v698_v16 = vpop.f32.mrf.mxu1 }
 0x240   : > { %v1760_v18 = vadd.f32 %v1036_v50, %v698_v16  ;;  %737 = vmax.xlane.f32.xlu1 %v1758_v15 }
 0x242   : > { %735 = vmax.xlane.f32.xlu0 %v1760_v18 }
 0x291   : > { %v710_v19 = vpop.xlane.xlu0 %709 }
 0x292   : > { %v740_v20 = vsub.f32 %v634_v52, %v710_v19 }
 0x294   : > { %v757_v21 = vmul.f32 1.442695, %v740_v20 }
 0x295   : > { %v708_v22 = vpop.xlane.xlu0 %707 }
 0x296   : > { %1286 = vpow2.f32 %v757_v21  ;;  %v739_v23 = vsub.f32 %v629_v54, %v708_v22 }
 0x298   : > { %v755_v24 = vmul.f32 1.442695, %v739_v23 }
 0x299   : > { %v714_v25 = vpop.xlane.xlu1 %713 }
 0x29a   : > { %1288 = vpow2.f32 %v755_v24  ;;  %v742_v26 = vsub.f32 %v644_v56, %v714_v25 }
 0x29c   : > { %v761_v27 = vmul.f32 1.442695, %v742_v26 }
 0x29d   : > { %v712_v28 = vpop.xlane.xlu1 %711 }
 0x29e   : > { %1290 = vpow2.f32 %v761_v27  ;;  %v741_v29 = vsub.f32 %v639_v17, %v712_v28 }
 0x2a0   : > { %v759_v30 = vmul.f32 1.442695, %v741_v29 }
 0x2a1   : > { %v718_v31 = vpop.xlane.xlu1 %717 }
 0x2a2   : > { %1292 = vpow2.f32 %v759_v30  ;;  %v744_v32 = vsub.f32 %v654_v59, %v718_v31 }
 0x2a3   : > { %v1764_v33 = vpop.eup %1286  ;;  %v716_v34 = vpop.xlane.xlu0 %715 }
 0x2a4   : > { %v765_v35 = vmul.f32 1.442695, %v744_v32  ;;  %v743_v36 = vsub.f32 %v649_v61, %v716_v34  ;;  %789 = vadd.xlane.f32.xlu1 %v1764_v33 }
 0x2a6   : > { %1294 = vpow2.f32 %v765_v35  ;;  %v763_v37 = vmul.f32 1.442695, %v743_v36 }
 0x2a7   : > { %v1767_v38 = vpop.eup %1288 }
 0x2a8   : > { %1296 = vpow2.f32 %v763_v37  ;;  %787 = vadd.xlane.f32.xlu0 %v1767_v38 }
 0x2a9   : > { %v722_v39 = vpop.xlane.xlu1 %721 }
 0x2aa   : > { %v746_v40 = vsub.f32 %v664_v63, %v722_v39 }
 0x2ab   : > { %v1770_v41 = vpop.eup %1290  ;;  %v720_v42 = vpop.xlane.xlu0 %719 }
 0x2ac   : > { %v769_v43 = vmul.f32 1.442695, %v746_v40  ;;  %v745_v44 = vsub.f32 %v1737_v1, %v720_v42  ;;  %793 = vadd.xlane.f32.xlu1 %v1770_v41 }
 0x2ae   : > { %1298 = vpow2.f32 %v769_v43  ;;  %v767_v45 = vmul.f32 1.442695, %v745_v44 }
 0x2af   : > { %v1774_v46 = vpop.eup %1292 }
 0x2b0   : > { %1300 = vpow2.f32 %v767_v45  ;;  %791 = vadd.xlane.f32.xlu0 %v1774_v46 }
 0x2b1   : > { %v726_v47 = vpop.xlane.xlu1 %725 }
 0x2b2   : > { %v748_v48 = vsub.f32 %v1740_v3, %v726_v47 }
 0x2b3   : > { %v1778_v49 = vpop.eup %1294  ;;  %v724_v50 = vpop.xlane.xlu0 %723 }
 0x2b4   : > { %v773_v51 = vmul.f32 1.442695, %v748_v48  ;;  %v747_v52 = vsub.f32 %v1742_v5, %v724_v50  ;;  %797 = vadd.xlane.f32.xlu1 %v1778_v49 }
 0x2b5   : > { %v1782_v53 = vpop.eup %1296 }
 0x2b6   : > { %1302 = vpow2.f32 %v773_v51  ;;  %v771_v54 = vmul.f32 1.442695, %v747_v52  ;;  %795 = vadd.xlane.f32.xlu0 %v1782_v53 }
 0x2b8   : > { %1304 = vpow2.f32 %v771_v54 }
 0x2b9   : > { %v730_v55 = vpop.xlane.xlu1 %729 }
 0x2ba   : > { %v750_v56 = vsub.f32 %v1746_v7, %v730_v55 }
 0x2bb   : > { %v1786_v57 = vpop.eup %1298  ;;  %v728_v17 = vpop.xlane.xlu0 %727 }
 0x2bc   : > { %v777_v58 = vmul.f32 1.442695, %v750_v56  ;;  %v749_v59 = vsub.f32 %v1748_v9, %v728_v17  ;;  %801 = vadd.xlane.f32.xlu1 %v1786_v57 }
 0x2bd   : > { %v1790_v60 = vpop.eup %1300 }
 0x2be   : > { %1306 = vpow2.f32 %v777_v58  ;;  %v775_v61 = vmul.f32 1.442695, %v749_v59  ;;  %799 = vadd.xlane.f32.xlu0 %v1790_v60 }
 0x2c0   : > { %1308 = vpow2.f32 %v775_v61 }
 0x2c1   : > { %v734_v62 = vpop.xlane.xlu1 %733 }
 0x2c2   : > { %v752_v63 = vsub.f32 %v1752_v11, %v734_v62 }
 0x2c3   : > { %v1794_v0 = vpop.eup %1302  ;;  %v732_v1 = vpop.xlane.xlu0 %731 }
 0x2c4   : > { %v781_v2 = vmul.f32 1.442695, %v752_v63  ;;  %v751_v3 = vsub.f32 %v1754_v13, %v732_v1  ;;  %805 = vadd.xlane.f32.xlu1 %v1794_v0 }
 0x2c5   : > { %v1798_v4 = vpop.eup %1304 }
 0x2c6   : > { %1310 = vpow2.f32 %v781_v2  ;;  %v779_v5 = vmul.f32 1.442695, %v751_v3  ;;  %803 = vadd.xlane.f32.xlu0 %v1798_v4 }
 0x2c8   : > { %1312 = vpow2.f32 %v779_v5 }
 0x2c9   : > { %v738_v6 = vpop.xlane.xlu1 %737 }
 0x2ca   : > { %v754_v7 = vsub.f32 %v1758_v15, %v738_v6 }
 0x2cb   : > { %v1802_v8 = vpop.eup %1306  ;;  %v736_v9 = vpop.xlane.xlu0 %735 }
 0x2cc   : > { %v785_v10 = vmul.f32 1.442695, %v754_v7  ;;  %v753_v11 = vsub.f32 %v1760_v18, %v736_v9  ;;  %809 = vadd.xlane.f32.xlu1 %v1802_v8 }
 0x2cd   : > { %v1806_v12 = vpop.eup %1308 }
 0x2ce   : > { %1314 = vpow2.f32 %v785_v10  ;;  %v783_v13 = vmul.f32 1.442695, %v753_v11  ;;  %807 = vadd.xlane.f32.xlu0 %v1806_v12 }
 0x2d0   : > { %1316 = vpow2.f32 %v783_v13 }
 0x2d3   : > { %v1809_v14 = vpop.eup %1310 }
 0x2d4   : > { %813 = vadd.xlane.f32.xlu1 %v1809_v14 }
 0x2d5   : > { %v1812_v15 = vpop.eup %1312 }
 0x2d6   : > { %811 = vadd.xlane.f32.xlu0 %v1812_v15 }
 0x2db   : > { %v1815_v16 = vpop.eup %1314 }
 0x2dc   : > { %817 = vadd.xlane.f32.xlu1 %v1815_v16 }
 0x2dd   : > { %v1818_v18 = vpop.eup %1316 }
 0x2de   : > { %815 = vadd.xlane.f32.xlu0 %v1818_v18 }
 0x32d   : > { %v790_v19 = vpop.xlane.xlu1 %789 }
 0x32e   : > { %1318 = vrcp.f32 %v790_v19 }
 0x331   : > { %v788_v20 = vpop.xlane.xlu0 %787 }
 0x332   : > { %1320 = vrcp.f32 %v788_v20 }
 0x335   : > { %v794_v21 = vpop.xlane.xlu1 %793 }
 0x336   : > { %1322 = vrcp.f32 %v794_v21 }
 0x339   : > { %v792_v22 = vpop.xlane.xlu0 %791 }
 0x33a   : > { %1324 = vrcp.f32 %v792_v22 }
 0x33b   : > { %v1319_v23 = vpop.eup %1318 }
 0x33c   : > { %v836_v24 = vmul.f32 %v1319_v23, %v790_v19 }
 0x33d   : > { %v798_v25 = vpop.xlane.xlu1 %797 }
 0x33e   : > { %v852_v26 = vsub.f32 2.0, %v836_v24  ;;  %1326 = vrcp.f32 %v798_v25 }
 0x33f   : > { %v1321_v27 = vpop.eup %1320  ;;  %v796_v28 = vpop.xlane.xlu0 %795 }
 0x340   : > { %v868_v29 = vmul.f32 %v1319_v23, %v852_v26  ;;  %v835_v30 = vmul.f32 %v1321_v27, %v788_v20  ;;  %1328 = vrcp.f32 %v796_v28 }
 0x342   : > { %v884_v31 = vmul.f32 %v1764_v33, %v868_v29  ;;  %v851_v32 = vsub.f32 2.0, %v835_v30 }
 0x343   : > { %v1323_v34 = vpop.eup %1322 }
 0x344   : > { %900 = vst [vmem:[%s1823_s12 + $0x8] sm:$0xff] %v884_v31  ;;  %v867_v35 = vmul.f32 %v1321_v27, %v851_v32  ;;  %v838_v36 = vmul.f32 %v1323_v34, %v794_v21 }
 0x345   : > { %v802_v37 = vpop.xlane.xlu1 %801 }
 0x346   : > { %v883_v39 = vmul.f32 %v1767_v38, %v867_v35  ;;  %v854_v40 = vsub.f32 2.0, %v838_v36  ;;  %1330 = vrcp.f32 %v802_v37 }
 0x347   : > { %v1325_v42 = vpop.eup %1324  ;;  %v800_v43 = vpop.xlane.xlu0 %799 }
 0x348   : > { %899 = vst [vmem:[%s1823_s12] sm:$0xff] %v883_v39  ;;  %v870_v44 = vmul.f32 %v1323_v34, %v854_v40  ;;  %v837_v33 = vmul.f32 %v1325_v42, %v792_v22  ;;  %1332 = vrcp.f32 %v800_v43 }
 0x34a   : > { %v886_v45 = vmul.f32 %v1770_v41, %v870_v44  ;;  %v853_v47 = vsub.f32 2.0, %v837_v33 }
 0x34b   : > { %v1327_v48 = vpop.eup %1326 }
 0x34c   : > { %902 = vst [vmem:[%s1823_s12 + $0x18] sm:$0xff] %v886_v45  ;;  %v869_v50 = vmul.f32 %v1325_v42, %v853_v47  ;;  %v840_v51 = vmul.f32 %v1327_v48, %v798_v25 }
 0x34d   : > { %v1329_v52 = vpop.eup %1328  ;;  %v806_v54 = vpop.xlane.xlu1 %805 }
 0x34e   : > { %v885_v38 = vmul.f32 %v1774_v46, %v869_v50  ;;  %v856_v55 = vsub.f32 2.0, %v840_v51  ;;  %v839_v56 = vmul.f32 %v1329_v52, %v796_v28  ;;  %1334 = vrcp.f32 %v806_v54 }
 0x34f   : > { %v804_v17 = vpop.xlane.xlu0 %803 }
 0x350   : > { %901 = vst [vmem:[%s1823_s12 + $0x10] sm:$0xff] %v885_v38  ;;  %v872_v58 = vmul.f32 %v1327_v48, %v856_v55  ;;  %v855_v59 = vsub.f32 2.0, %v839_v56  ;;  %1336 = vrcp.f32 %v804_v17 }
 0x352   : > { %v888_v41 = vmul.f32 %v1778_v49, %v872_v58  ;;  %v871_v61 = vmul.f32 %v1329_v52, %v855_v59 }
 0x353   : > { %v1331_v62 = vpop.eup %1330 }
 0x354   : > { %904 = vst [vmem:[%s1823_s12 + $0x28] sm:$0xff] %v888_v41  ;;  %v887_v63 = vmul.f32 %v1782_v53, %v871_v61  ;;  %v842_v1 = vmul.f32 %v1331_v62, %v802_v37 }
 0x355   : > { %v1333_v2 = vpop.eup %1332  ;;  %v810_v46 = vpop.xlane.xlu1 %809 }
 0x356   : > { %903 = vst [vmem:[%s1823_s12 + $0x20] sm:$0xff] %v887_v63  ;;  %v858_v3 = vsub.f32 2.0, %v842_v1  ;;  %v841_v5 = vmul.f32 %v1333_v2, %v800_v43  ;;  %1338 = vrcp.f32 %v810_v46 }
 0x357   : > { %v808_v6 = vpop.xlane.xlu0 %807 }
 0x358   : > { %v874_v7 = vmul.f32 %v1331_v62, %v858_v3  ;;  %v857_v9 = vsub.f32 2.0, %v841_v5  ;;  %1340 = vrcp.f32 %v808_v6 }
 0x35a   : > { %v890_v49 = vmul.f32 %v1786_v57, %v874_v7  ;;  %v873_v10 = vmul.f32 %v1333_v2, %v857_v9 }
 0x35b   : > { %v1335_v11 = vpop.eup %1334 }
 0x35c   : > { %906 = vst [vmem:[%s1823_s12 + $0x38] sm:$0xff] %v890_v49  ;;  %v889_v53 = vmul.f32 %v1790_v60, %v873_v10  ;;  %v844_v13 = vmul.f32 %v1335_v11, %v806_v54 }
 0x35d   : > { %v1337_v19 = vpop.eup %1336  ;;  %v814_v20 = vpop.xlane.xlu1 %813 }
 0x35e   : > { %905 = vst [vmem:[%s1823_s12 + $0x30] sm:$0xff] %v889_v53  ;;  %v860_v21 = vsub.f32 2.0, %v844_v13  ;;  %v843_v22 = vmul.f32 %v1337_v19, %v804_v17  ;;  %1342 = vrcp.f32 %v814_v20 }
 0x35f   : > { %v812_v23 = vpop.xlane.xlu0 %811 }
 0x360   : > { %v876_v24 = vmul.f32 %v1335_v11, %v860_v21  ;;  %v859_v25 = vsub.f32 2.0, %v843_v22  ;;  %1344 = vrcp.f32 %v812_v23 }
 0x362   : > { %v892_v57 = vmul.f32 %v1794_v0, %v876_v24  ;;  %v875_v26 = vmul.f32 %v1337_v19, %v859_v25 }
 0x363   : > { %v1339_v27 = vpop.eup %1338 }
 0x364   : > { %908 = vst [vmem:[%s1823_s12 + $0x48] sm:$0xff] %v892_v57  ;;  %v891_v60 = vmul.f32 %v1798_v4, %v875_v26  ;;  %v846_v28 = vmul.f32 %v1339_v27, %v810_v46 }
 0x365   : > { %v1341_v29 = vpop.eup %1340  ;;  %v818_v30 = vpop.xlane.xlu1 %817 }
 0x366   : > { %907 = vst [vmem:[%s1823_s12 + $0x40] sm:$0xff] %v891_v60  ;;  %v862_v31 = vsub.f32 2.0, %v846_v28  ;;  %v845_v32 = vmul.f32 %v1341_v29, %v808_v6  ;;  %1346 = vrcp.f32 %v818_v30 }
 0x367   : > { %v816_v34 = vpop.xlane.xlu0 %815 }
 0x368   : > { %v878_v35 = vmul.f32 %v1339_v27, %v862_v31  ;;  %v861_v36 = vsub.f32 2.0, %v845_v32  ;;  %1348 = vrcp.f32 %v816_v34 }
 0x36a   : > { %v894_v0 = vmul.f32 %v1802_v8, %v878_v35  ;;  %v877_v37 = vmul.f32 %v1341_v29, %v861_v36 }
 0x36b   : > { %v1343_v39 = vpop.eup %1342 }
 0x36c   : > { %910 = vst [vmem:[%s1823_s12 + $0x58] sm:$0xff] %v894_v0  ;;  %v893_v4 = vmul.f32 %v1806_v12, %v877_v37  ;;  %v848_v40 = vmul.f32 %v1343_v39, %v814_v20 }
 0x36d   : > { %v1345_v42 = vpop.eup %1344 }
 0x36e   : > { %909 = vst [vmem:[%s1823_s12 + $0x50] sm:$0xff] %v893_v4  ;;  %v864_v43 = vsub.f32 2.0, %v848_v40  ;;  %v847_v44 = vmul.f32 %v1345_v42, %v812_v23 }
 0x370   : > { %v880_v33 = vmul.f32 %v1343_v39, %v864_v43  ;;  %v863_v45 = vsub.f32 2.0, %v847_v44 }
 0x372   : > { %v896_v47 = vmul.f32 %v1809_v14, %v880_v33  ;;  %v879_v48 = vmul.f32 %v1345_v42, %v863_v45 }
 0x373   : > { %v1347_v50 = vpop.eup %1346 }
 0x374   : > { %912 = vst [vmem:[%s1823_s12 + $0x68] sm:$0xff] %v896_v47  ;;  %v895_v8 = vmul.f32 %v1812_v15, %v879_v48  ;;  %v850_v51 = vmul.f32 %v1347_v50, %v818_v30 }
 0x375   : > { %v1349_v12 = vpop.eup %1348 }
 0x376   : > { %911 = vst [vmem:[%s1823_s12 + $0x60] sm:$0xff] %v895_v8  ;;  %v866_v52 = vsub.f32 2.0, %v850_v51  ;;  %v849_v54 = vmul.f32 %v1349_v12, %v816_v34 }
 0x378   : > { %v882_v38 = vmul.f32 %v1347_v50, %v866_v52  ;;  %v865_v55 = vsub.f32 2.0, %v849_v54 }
 0x37a   : > { %v898_v14 = vmul.f32 %v1815_v16, %v882_v38  ;;  %v881_v56 = vmul.f32 %v1349_v12, %v865_v55 }
 0x37c   : > { %914 = vst [vmem:[%s1823_s12 + $0x78] sm:$0xff] %v898_v14  ;;  %v897_v15 = vmul.f32 %v1818_v18, %v881_v56 }
 0x37e   : > { %913 = vst [vmem:[%s1823_s12 + $0x70] sm:$0xff] %v897_v15 }
 0x37f   : > { %1443 = shalt.err (!%p1440_p9)
}
 0x380   : > { %s1444_s24 = scalar_lea.hbm %s1858_s13, 2048  ;;  %s1448_s10 = scalar_lea.hbm %s1911_s5, 4096 }
 0x381   : > { %p1445_p13 = scmp.ne.s32.totalorder %s1858_s13, %s1444_s24  ;;  %p1449_p4 = scmp.lt.s32.totalorder %s1858_s13, %s1911_s5 }
 0x382   : > { %p1450_p8 = scmp.lt.s32.totalorder %s1448_s10, %s1444_s24 }
 0x383   : > { %p1446_p5 = pnand %p1445_p13, %p1927_p10 }
 0x384   : > { %p1451_p3 = por %p1450_p8, %p1449_p4 }
 0x385   : > { %p1447_p0 = pneg %p1446_p5 }
 0x387   : > { %p1452_p11 = pnand %p1451_p3, %p1447_p0 }
 0x389   : > { %1455 = shalt.err (!%p1452_p11)
}
 0x38a   : > { %s1508_s28 = smov 128   ;;  %s1509_s7 = smov 8  }
 0x38b   : > { %1223 = dma.vmem_to_hbm [thread:$0]  (%p1927_p10), %s1860_s6, 2048, %s1858_s13, %s916_s14, %s1508_s28, %s1508_s28, %s1509_s7  }
 0x38c PF: > { %s944_s9 = sand.u32 1, %s1486_s18   ;;  %p1928_p1 = scmp.ne.s32.totalorder %s1917_s25, 0 }
 0x38d   : > { %p1929_p2 = scmp.ge.s32.totalorder %s1498_s21, 2  ;;  %s945_s22 = scalar_lea.sflag [#allocation4], %s944_s9 }
 0x38f   : > { %p1237_p6 = pnand %p1929_p2, %p1928_p1 }
 0x391   : > { %p1238_p12 = pneg %p1237_p6 }
 0x393   : > { %1481 = dma.done.wait (%p1238_p12), %s945_s22, 2048  }
 0x394   : > { %1483 = vsyncadd (%p1238_p12), %s945_s22, 4294965248  ;;  %p19_p7 = scmp.ge.s32.totalorder %s1612_s15, 4   ;;  %s1930_s18 = smov %s1490_s19 }
 0x395   : > { %s1931_s19 = smov %s1494_s20  ;;  %s1932_s20 = smov %s1628_s27 }
 0x396   : > { %s1933_s21 = smov %s1612_s15  ;;  %21 = sbr.rel (!%p19_p7) target bundleno = 6 (0x6), region = 93 }
 0x39b   :  { %950 = vsyncpa [#allocation3], 1 }
 0x39c   :  { %952 = vsyncpa [#allocation3 + $0x1], 1 }
 0x39d   :  { %953 = vsyncpa [#allocation6], 1 }
 0x39e   :  { %954 = vsyncpa [#allocation4], 1 }
 0x39f   :  { %956 = vsyncpa [#allocation4 + $0x1], 1 }

</bundles_post_ra>
